<compile_context>
chip_gen: v7x
topology: tpu7x:2x2x1
jax: 0.10.0
libtpu: 0.0.40
codegen_flags: <defaults>
</compile_context>

<pallas_src>
import jax
import jax.numpy as jnp
from jax.experimental import pallas as pl
from jax.experimental.pallas import tpu as pltpu


def _conv1x1_kernel(x_ref, w_ref, b_ref, o_ref):
    # x_ref: (Cin, T) in VMEM   (lane-dense spatial tile)
    # w_ref: (Cout, Cin) in SMEM (scalar weights)
    # b_ref: (Cout,)     in SMEM (scalar bias)
    # o_ref: (Cout, T) in VMEM
    cin = x_ref.shape[0]
    cout = o_ref.shape[0]
    x = x_ref[...].astype(jnp.float32)          # (Cin, T)
    for co in range(cout):                      # static unroll, Cout=2
        acc = x[0:1, :] * w_ref[co, 0]
        for ci in range(1, cin):                # static unroll, Cin=3
            acc = acc + x[ci:ci + 1, :] * w_ref[co, ci]
        o_ref[co:co + 1, :] = (acc + b_ref[co]).astype(o_ref.dtype)


def feature_map_forward(x_nchw, weight, bias, *, max_tile=8192):
    """1x1 conv forward.

    x_nchw: (N, Cin, H, W); weight: (Cout, Cin, 1, 1); bias: (Cout,).
    Returns (N, Cout, H, W), same dtype as x.
    """
    N, Cin, H, W = x_nchw.shape
    Cout = weight.shape[0]
    HW = H * W

    # Free reshape: NCHW -> (N, Cin, H*W).  No transposes, no padding.
    x3 = x_nchw.reshape(N, Cin, HW)
    w_mat = weight.reshape(Cout, Cin)           # (Cout, Cin) scalars -> SMEM
    b_vec = bias.reshape(Cout)                  # (Cout,)     scalars -> SMEM

    # Lane tile: whole H*W plane when it fits (equals full dim, so any size is
    # legal); otherwise a large multiple of 128 (~8K pixels = 96 KiB input +
    # 64 KiB output per step, double-buffered: well under every chip's scoped
    # VMEM default).  Ragged tail blocks are masked by Pallas.
    if HW <= max_tile:
        T = HW
        num_t = 1
    else:
        T = max_tile                             # multiple of 128
        num_t = pl.cdiv(HW, T)

    out3 = pl.pallas_call(
        _conv1x1_kernel,
        out_shape=jax.ShapeDtypeStruct((N, Cout, HW), x_nchw.dtype),
        grid=(N, num_t),
        in_specs=[
            # Spatial tile of one image: kernel sees (Cin, T), lane-dense.
            pl.BlockSpec((None, Cin, T), lambda n, j: (n, 0, j)),
            # Tiny weight / bias live in SMEM for the whole kernel.
            pl.BlockSpec(memory_space=pltpu.MemorySpace.SMEM),
            pl.BlockSpec(memory_space=pltpu.MemorySpace.SMEM),
        ],
        out_specs=pl.BlockSpec((None, Cout, T), lambda n, j: (n, 0, j)),
        compiler_params=pltpu.CompilerParams(
            dimension_semantics=("parallel", "parallel"),
        ),
    )(x3, w_mat, b_vec)

    # Free reshape back to NCHW.
    return out3.reshape(N, Cout, H, W)


if __name__ == "__main__":
    input_channels = 3
    output_channels = 2

    key = jax.random.PRNGKey(0)
    kx, kw, kb = jax.random.split(key, 3)

    # Deterministic parameter init (synthetic, matching nn.Conv2d shapes).
    fan_in = input_channels * 1 * 1
    bound = 1.0 / (fan_in ** 0.5)
    weight = jax.random.uniform(
        kw, (output_channels, input_channels, 1, 1),
        minval=-bound, maxval=bound, dtype=jnp.float32)
    bias = jax.random.uniform(
        kb, (output_channels,), minval=-bound, maxval=bound, dtype=jnp.float32)

    # Example input: N=2, Cin=3, H=W=16 (NCHW, like PyTorch).
    x = jax.random.normal(kx, (2, input_channels, 16, 16), dtype=jnp.float32)

    out = feature_map_forward(x, weight, bias)
    jax.block_until_ready(out)

    # Reference check against plain-JAX einsum (1x1 conv).
    ref = jnp.einsum("nchw,oc->nohw", x,
                     weight.reshape(output_channels, input_channels))
    ref = ref + bias.reshape(1, output_channels, 1, 1)
    assert out.shape == (2, output_channels, 16, 16)
    assert jnp.allclose(out, ref, atol=1e-5, rtol=1e-5)

    print("KERNEL_OK")
</pallas_src>

<mosaic_0001>
module attributes {stable_mosaic.version = 11 : i64} {
  func.func @_conv1x1_kernel(%arg0: i32, %arg1: i32, %arg2: memref<1x3x256xf32, #tpu.memory_space<vmem>>, %arg3: memref<2x3xf32, #tpu.memory_space<smem>>, %arg4: memref<2xf32, #tpu.memory_space<smem>>, %arg5: memref<1x2x256xf32, #tpu.memory_space<vmem>>) attributes {dimension_semantics = [#tpu.dimension_semantics<parallel>, #tpu.dimension_semantics<parallel>], iteration_bounds = array<i64: 2, 1>, scalar_prefetch = 0 : i64, scratch_operands = 0 : i64, tpu.core_type = #tpu.core_type<tc>, window_params = [{transform_indices = @transform_0, window_bounds = array<i64: 1, 3, 256>}, {transform_indices = @transform_1, window_bounds = array<i64: 2, 3>}, {transform_indices = @transform_2, window_bounds = array<i64: 2>}, {transform_indices = @transform_3, window_bounds = array<i64: 1, 2, 256>}]} {
    %c0 = arith.constant 0 : index
    %c0_0 = arith.constant 0 : index
    %c0_1 = arith.constant 0 : index
    %0 = vector.load %arg2[%c0, %c0_0, %c0_1] : memref<1x3x256xf32, #tpu.memory_space<vmem>>, vector<1x3x256xf32>
    %1 = vector.shape_cast %0 : vector<1x3x256xf32> to vector<3x256xf32>
    %2 = vector.extract_strided_slice %1 {offsets = [0, 0], sizes = [1, 256], strides = [1, 1]} : vector<3x256xf32> to vector<1x256xf32>
    %c0_2 = arith.constant 0 : index
    %c0_3 = arith.constant 0 : index
    %3 = memref.load %arg3[%c0_2, %c0_3] : memref<2x3xf32, #tpu.memory_space<smem>>
    %4 = vector.broadcast %3 : f32 to vector<1x256xf32>
    %5 = arith.mulf %2, %4 : vector<1x256xf32>
    %6 = vector.extract_strided_slice %1 {offsets = [1, 0], sizes = [1, 256], strides = [1, 1]} : vector<3x256xf32> to vector<1x256xf32>
    %c0_4 = arith.constant 0 : index
    %c1 = arith.constant 1 : index
    %7 = memref.load %arg3[%c0_4, %c1] : memref<2x3xf32, #tpu.memory_space<smem>>
    %8 = vector.broadcast %7 : f32 to vector<1x256xf32>
    %9 = arith.mulf %6, %8 : vector<1x256xf32>
    %10 = arith.addf %5, %9 : vector<1x256xf32>
    %11 = vector.extract_strided_slice %1 {offsets = [2, 0], sizes = [1, 256], strides = [1, 1]} : vector<3x256xf32> to vector<1x256xf32>
    %c0_5 = arith.constant 0 : index
    %c2 = arith.constant 2 : index
    %12 = memref.load %arg3[%c0_5, %c2] : memref<2x3xf32, #tpu.memory_space<smem>>
    %13 = vector.broadcast %12 : f32 to vector<1x256xf32>
    %14 = arith.mulf %11, %13 : vector<1x256xf32>
    %15 = arith.addf %10, %14 : vector<1x256xf32>
    %c0_6 = arith.constant 0 : index
    %16 = memref.load %arg4[%c0_6] : memref<2xf32, #tpu.memory_space<smem>>
    %17 = vector.broadcast %16 : f32 to vector<1x256xf32>
    %18 = arith.addf %15, %17 : vector<1x256xf32>
    %c0_7 = arith.constant 0 : index
    %c0_8 = arith.constant 0 : index
    %c0_9 = arith.constant 0 : index
    %19 = vector.load %arg5[%c0_7, %c0_8, %c0_9] : memref<1x2x256xf32, #tpu.memory_space<vmem>>, vector<1x1x256xf32>
    %20 = vector.shape_cast %19 : vector<1x1x256xf32> to vector<1x256xf32>
    %21 = vector.shape_cast %18 : vector<1x256xf32> to vector<1x1x256xf32>
    tpu.vector_store %arg5[%c0_7, %c0_8, %c0_9], %21 {strides = array<i32>} : memref<1x2x256xf32, #tpu.memory_space<vmem>>, vector<1x1x256xf32>,
    %22 = vector.extract_strided_slice %1 {offsets = [0, 0], sizes = [1, 256], strides = [1, 1]} : vector<3x256xf32> to vector<1x256xf32>
    %c1_10 = arith.constant 1 : index
    %c0_11 = arith.constant 0 : index
    %23 = memref.load %arg3[%c1_10, %c0_11] : memref<2x3xf32, #tpu.memory_space<smem>>
    %24 = vector.broadcast %23 : f32 to vector<1x256xf32>
    %25 = arith.mulf %22, %24 : vector<1x256xf32>
    %26 = vector.extract_strided_slice %1 {offsets = [1, 0], sizes = [1, 256], strides = [1, 1]} : vector<3x256xf32> to vector<1x256xf32>
    %c1_12 = arith.constant 1 : index
    %c1_13 = arith.constant 1 : index
    %27 = memref.load %arg3[%c1_12, %c1_13] : memref<2x3xf32, #tpu.memory_space<smem>>
    %28 = vector.broadcast %27 : f32 to vector<1x256xf32>
    %29 = arith.mulf %26, %28 : vector<1x256xf32>
    %30 = arith.addf %25, %29 : vector<1x256xf32>
    %31 = vector.extract_strided_slice %1 {offsets = [2, 0], sizes = [1, 256], strides = [1, 1]} : vector<3x256xf32> to vector<1x256xf32>
    %c1_14 = arith.constant 1 : index
    %c2_15 = arith.constant 2 : index
    %32 = memref.load %arg3[%c1_14, %c2_15] : memref<2x3xf32, #tpu.memory_space<smem>>
    %33 = vector.broadcast %32 : f32 to vector<1x256xf32>
    %34 = arith.mulf %31, %33 : vector<1x256xf32>
    %35 = arith.addf %30, %34 : vector<1x256xf32>
    %c1_16 = arith.constant 1 : index
    %36 = memref.load %arg4[%c1_16] : memref<2xf32, #tpu.memory_space<smem>>
    %37 = vector.broadcast %36 : f32 to vector<1x256xf32>
    %38 = arith.addf %35, %37 : vector<1x256xf32>
    %c0_17 = arith.constant 0 : index
    %c1_18 = arith.constant 1 : index
    %c0_19 = arith.constant 0 : index
    %39 = vector.load %arg5[%c0_17, %c1_18, %c0_19] : memref<1x2x256xf32, #tpu.memory_space<vmem>>, vector<1x1x256xf32>
    %40 = vector.shape_cast %39 : vector<1x1x256xf32> to vector<1x256xf32>
    %41 = vector.shape_cast %38 : vector<1x256xf32> to vector<1x1x256xf32>
    tpu.vector_store %arg5[%c0_17, %c1_18, %c0_19], %41 {strides = array<i32>} : memref<1x2x256xf32, #tpu.memory_space<vmem>>, vector<1x1x256xf32>,
    return
  }
  func.func @transform_0(%arg0: i32, %arg1: i32) -> (i32, i32, i32) {
    %c0_i32 = arith.constant 0 : i32
    %c0_i32_0 = arith.constant 0 : i32
    return %arg0, %c0_i32, %arg1 : i32, i32, i32
  }
  func.func @transform_1(%arg0: i32, %arg1: i32) -> (i32, i32) {
    %c0_i32 = arith.constant 0 : i32
    %c0_i32_0 = arith.constant 0 : i32
    %c0_i32_1 = arith.constant 0 : i32
    return %c0_i32, %c0_i32_0 : i32, i32
  }
  func.func @transform_2(%arg0: i32, %arg1: i32) -> i32 {
    %c0_i32 = arith.constant 0 : i32
    %c0_i32_0 = arith.constant 0 : i32
    return %c0_i32 : i32
  }
  func.func @transform_3(%arg0: i32, %arg1: i32) -> (i32, i32, i32) {
    %c0_i32 = arith.constant 0 : i32
    %c0_i32_0 = arith.constant 0 : i32
    return %arg0, %c0_i32, %arg1 : i32, i32, i32
  }
}

</mosaic_0001>

<bundles_post_ra>
// kernel: tpu_custom_call.1
= control target key start
LH: loop header
LB: loop body
LE: loop exit
PB: predicated region body
PF: predicated region fallthrough
CT: control target
= control target key end

     0   :  { %8 = vsyncpa [#allocation4], 0  ;;  %s828_s0 = inlined_call_operand.vmem [shape: f32[2,3,256], index: 0, kind: input, shape index: {}]   ;;  %s829_s1 = inlined_call_operand.vmem [shape: f32[2,3], index: 1, kind: input, shape index: {}]   ;;  %s830_s2 = inlined_call_operand.vmem [shape: f32[2], index: 2, kind: input, shape index: {}]   ;;  %s831_s3 = inlined_call_operand.hbm [shape: f32[2,2,256], index: 3, kind: output, shape index: {}]  }
   0x1   :  { %9 = vsyncpa [#allocation6], 0 }
   0x2   :  { %10 = vsyncpa [#allocation3], 0 }
   0x3   :  { %12 = vsyncpa [#allocation3 + $0x1], 0  ;;  %s675_s12 = smov 0   ;;  %s677_s13 = smov 0  }
   0x4   :  { %s679_s14 = smov 0   ;;  %s681_s15 = smov 0  }
   0x5   :  { %s683_s16 = smov 0   ;;  %s685_s17 = smov 0  }
   0x6 LB: > { %s426_s18 = sadd.s32 4294967295, %s649_s17   ;;  %s427_s19 = sadd.s32 4294967294, %s649_s17   ;;  %s649_s17 = sphi %s685_s17, %s18_s17   ;;  %s645_s16 = sphi %s683_s16, %s849_s16   ;;  %s641_s15 = sphi %s681_s15, %s848_s15   ;;  %s637_s14 = sphi %s679_s14, %s847_s14   ;;  %s633_s13 = sphi %s677_s13, %s846_s13   ;;  %s629_s12 = sphi %s675_s12, %s845_s12  }
   0x7   : > { %s30_s20 = sadd.s32 1, %s645_s16  ;;  %s109_s21 = sadd.s32 1, %s637_s14 }
   0x8   : > { %p32_p0 = scmp.ge.s32.totalorder %s30_s20, 2  ;;  %p119_p1 = scmp.ne.s32.totalorder %s637_s14, %s633_s13 }
   0x9   : > { %p120_p2 = scmp.eq.s32.totalorder %s426_s18, 1  ;;  %p125_p3 = scmp.ne.s32.totalorder %s633_s13, %s629_s12 }
   0xa   : > { %s851_s20 = smov (%p32_p0, %s30_s20), 0  ;;  %p126_p5 = scmp.eq.s32.totalorder %s427_s19, 1 }
   0xb   : > { %p715_p4 = por %p120_p2, %p119_p1  ;;  %s104_s23 = ssub.s32 %s645_s16, %s851_s20 }
   0xc   : > { %p428_p6 = scmp.ge.s32.totalorder %s649_s17, 1  ;;  %p107_p7 = scmp.eq.s32.totalorder %s104_s23, 0 }
   0xd   : > { %s836_s22 = scalar_select %p715_p4, 1, 0 }
   0xe   : > { %p722_p8 = por %p126_p5, %p125_p3  ;;  %p133_p9 = scmp.lt.s32.totalorder %s649_s17, 3 }
   0xf   : > { %s728_s25 = scalar_select %p107_p7, %s637_s14, %s109_s21  }
  0x10   : > { %s837_s24 = scalar_select %p722_p8, 1, 0 }
  0x11   : > { %p730_p10 = pnand %p428_p6, %p133_p9  ;;  %p734_p11 = scmp.eq.s32.totalorder %s426_s18, 0 }
  0x12   : > { %s146_s30 = sshll.u32 %s829_s1, 4  ;;  %s157_s6 = sshll.u32 %s830_s2, 4  ;;  %s147_s30 = int_to_ptr.vmem [resolvable:$true] %s146_s30  ;;  %s158_s6 = int_to_ptr.vmem [resolvable:$true] %s157_s6 }
  0x13   : > { %s838_s26 = scalar_select %p730_p10, 1, 0 }
  0x14   : > { %s839_s27 = scalar_select %p734_p11, 1, 0 }
  0x15   : > { %p466_p12 = pneg %p730_p10  ;;  %s533_s8 = scalar_lea.vmem %s147_s30, 32 }
  0x16   : > { %p534_p0 = scmp.ne.s32.totalorder %s147_s30, %s533_s8  ;;  %p541_p5 = scmp.lt.s32.totalorder %s147_s30, %s147_s30 }
  0x17   : > { %p748_p13 = pnand %p734_p11, %p466_p12  ;;  %p542_p6 = scmp.lt.s32.totalorder %s533_s8, %s533_s8 }
  0x19   : > { %p535_p1 = pneg %p748_p13  ;;  %p543_p7 = por %p542_p6, %p541_p5 }
  0x1b   : > { %p536_p2 = pnand %p535_p1, %p534_p0 }
  0x1d   : > { %p537_p3 = pneg %p536_p2 }
  0x1f   : > { %p544_p9 = pnand %p543_p7, %p537_p3 }
  0x21   : > { %547 = shalt.err (!%p544_p9)
}
  0x22   : > { %s651_s9 = smov [#allocation2]   ;;  %s548_s10 = scalar_lea.vmem %s158_s6, 16 }
  0x23   : > { %469 = dma.vmem_to_smem (!%p748_p13), %s147_s30, 32, %s651_s9, [#allocation4]  }
  0x24   : > { %p549_p12 = scmp.ne.s32.totalorder %s158_s6, %s548_s10  ;;  %p556_p11 = scmp.lt.s32.totalorder %s158_s6, %s158_s6 }
  0x25   : > { %p557_p10 = scmp.lt.s32.totalorder %s548_s10, %s548_s10 }
  0x26   : > { %p551_p8 = pnand %p549_p12, %p535_p1 }
  0x27   : > { %p558_p0 = por %p557_p10, %p556_p11 }
  0x28   : > { %p552_p4 = pneg %p551_p8 }
  0x2a   : > { %p559_p2 = pnand %p558_p0, %p552_p4 }
  0x2c   : > { %562 = shalt.err (!%p559_p2)
}
  0x2d   : > { %s652_s11 = smov [#allocation5]   ;;  %p841_p3 = scmp.ne.s32.totalorder %s838_s26, 0 }
  0x2e   : > { %472 = dma.vmem_to_smem (!%p748_p13), %s158_s6, 16, %s652_s11, [#allocation6]  }
  0x2f   : > { %183 = sbr.rel (%p841_p3) target bundleno = 97 (0x61), region = 32  ;;  %p842_p5 = scmp.ne.s32.totalorder (!%p841_p3), %s839_s27, 0 }
  0x36   : > { %616 = dma.done.wait (%p842_p5), [#allocation4], 32  }
  0x37   : > { %618 = vsyncadd (%p842_p5), [#allocation4], 4294967264 }
  0x38   : > { %620 = dma.done.wait (%p842_p5), [#allocation6], 16  }
  0x39   : > { %622 = vsyncadd (%p842_p5), [#allocation6], 4294967280 }
  0x3a   : > { %193 = sfence }
  0x3b   : > { %p217_p4 = scmp.lt.s32.totalorder %s641_s15, 1  ;;  %s228_s18 = sld [smem:[#allocation2]]  ;;  %v653_v0 = vmov 1966171168   ;;  %v254_v2 = vlaneseq }
  0x3c   : > { %s438_s19 = sld [smem:[#allocation2 + $0x1]]  ;;  %s440_s23 = sld [smem:[#allocation2 + $0x2]]  ;;  %v252_v1 = vunpack.c.l.s4 %v653_v0 }
  0x3d   : > { %s218_s21 = scalar_select %p217_p4, %s641_s15, 1  ;;  %v255_v10 = vshrl.u32 %v254_v2, 7  ;;  %vm268_vm0 = vcmp.lt.s32.totalorder %v254_v2, 256 }
  0x3e   : > { %s773_s4 = sld [smem:[#allocation5]]  ;;  %s443_s5 = sld [smem:[#allocation2 + $0x81]]  ;;  %v253_v9 = vunpack.c.0.s8 %v252_v1 }
  0x3f   : > { %s454_s26 = sshll.u32 %s218_s21, 3  ;;  %s442_s27 = sld [smem:[#allocation2 + $0x80]] }
  0x40   : > { %s224_s30 = scalar_lea.vmem %s828_s0, %s454_s26  ;;  %s445_s6 = sld [smem:[#allocation2 + $0x82]]  ;;  %v256_v17 = vsub.s32 %v253_v9, %v255_v10 }
  0x41   : > { %v227_v3 = vld [vmem:[%s224_s30] sm:$0x77]  ;;  %v229_v4 = vstv %s228_s18  ;;  %s447_s7 = sld [smem:[#allocation5 + $0x1]]  ;;  %s213_s8 = sand.u32 1, %s633_s13  }
  0x42   : > { %v232_v5 = vstv %s438_s19  ;;  %v230_v6 = vmul.f32 %v229_v4, %v227_v3  ;;  %v240_v8 = vstv %s440_s23  ;;  %s435_s9 = sshll.u32 %s213_s8, 2  ;;  %s455_s18 = sshll.u32 %s641_s15, 6 }
  0x43   : > { %v233_v7 = vmul.f32 %v232_v5, %v227_v3  ;;  %v241_v12 = vmul.f32 %v240_v8, %v227_v3  ;;  %s215_s10 = scalar_lea.vmem [#allocation7], %s435_s9  ;;  %s783_s23 = scalar_lea.hbm %s831_s3, %s455_s18 }
  0x44   : > { %v248_v16 = vstv %s773_s4  ;;  %v275_v18 = vstv %s443_s5  ;;  %s328_s11 = sshll.u32 %s215_s10, 4  ;;  %s312_s26 = scalar_lea.sflag [#allocation3], %s213_s8  ;;  %s778_s11 = int_to_ptr.vmem [resolvable:$true] %s328_s11 }
  0x45   : > { %v439_v11 = vrot.slane %v233_v7, 9  ;;  %v441_v14 = vrot.slane %v241_v12, 10  ;;  %v272_v15 = vstv %s442_s27  ;;  %v276_v22 = vmul.f32 %v275_v18, %v227_v3  ;;  %s563_s28 = scalar_lea.vmem %s778_s11, 64  ;;  %p843_p10 = scmp.ne.s32.totalorder %s836_s22, 0 }
  0x46   : > { %v283_v19 = vstv %s445_s6  ;;  %v273_v21 = vmul.f32 %v272_v15, %v227_v3  ;;  %p564_p8 = scmp.ne.s32.totalorder %s778_s11, %s563_s28  ;;  %s654_s15 = smov [#allocation7]  }
  0x47   : > { %v238_v13 = vadd.f32 %v439_v11, %v230_v6  ;;  %v284_v23 = vmul.f32 %v283_v19, %v227_v3  ;;  %v444_v25 = vrot.slane %v276_v22, 9  ;;  %v291_v29 = vstv %s447_s7  ;;  %s567_s29 = sshll.u32 %s654_s15, 4  ;;  %s568_s29 = int_to_ptr.vmem [resolvable:$false] %s567_s29 }
  0x48   : > { %p565_p11 = pnand %p564_p8, %p843_p10  ;;  %s569_s30 = scalar_lea.vmem %s568_s29, 128 }
  0x49   : > { %v246_v20 = vadd.f32 %v441_v14, %v238_v13  ;;  %v446_v26 = vrot.slane %v284_v23, 10  ;;  %v281_v28 = vadd.f32 %v444_v25, %v273_v21  ;;  %p570_p1 = scmp.lt.s32.totalorder %s778_s11, %s568_s29  ;;  %p571_p6 = scmp.lt.s32.totalorder %s569_s30, %s563_s28 }
  0x4a   : > { %p566_p13 = pneg %p565_p11 }
  0x4b   : > { %v249_v24 = vadd.f32 %v248_v16, %v246_v20  ;;  %v289_v31 = vadd.f32 %v446_v26, %v281_v28  ;;  %p572_p7 = por %p571_p6, %p570_p1 }
  0x4d   : > { %v257_v27 = vrot.slane %v249_v24, %v256_v17  ;;  %v292_v32 = vadd.f32 %v291_v29, %v289_v31  ;;  %p573_p9 = pnand %p572_p7, %p566_p13 }
  0x4f   : > { %v264_v30 = vrot.slane %v257_v27, %v256_v17  ;;  %v300_v33 = vrot.slane %v292_v32, %v256_v17 }
  0x51   : > { %270 = vst.msk [vmem:[%s215_s10] ss:$2 sm:$0x3] %vm268_vm0, %v264_v30  ;;  %v307_v34 = vrot.slane %v300_v33, %v256_v17 }
  0x53   : > { %448 = vst.msk [vmem:[%s215_s10 + $0x1] ss:$2 sm:$0x3] %vm268_vm0, %v307_v34 }
  0x54   : > { %576 = shalt.err (!%p573_p9)
}
  0x55   : > { %s577_s4 = scalar_lea.hbm %s783_s23, 64  ;;  %s581_s6 = scalar_lea.hbm %s831_s3, 128 }
  0x56   : > { %p578_p12 = scmp.ne.s32.totalorder %s783_s23, %s577_s4  ;;  %p582_p3 = scmp.lt.u32.totalorder %s783_s23, %s831_s3 }
  0x57   : > { %p583_p5 = scmp.lt.u32.totalorder %s581_s6, %s577_s4  ;;  %p585_p8 = scmp.lt.u32.totalorder %s577_s4, %s783_s23 }
  0x58   : > { %p579_p0 = pnand %p578_p12, %p843_p10 }
  0x59   : > { %p584_p4 = por %p583_p5, %p582_p3 }
  0x5a   : > { %p580_p2 = pneg %p579_p0 }
  0x5b   : > { %p586_p11 = por %p585_p8, %p584_p4 }
  0x5d   : > { %p587_p13 = pnand %p586_p11, %p580_p2 }
  0x5f   : > { %590 = shalt.err (!%p587_p13)
}
  0x60   : > { %464 = dma.vmem_to_hbm [thread:$0]  (%p843_p10), %s778_s11, 64, %s783_s23, %s312_s26  }
  0x61 PF: > { %p481_p1 = scmp.ge.s32.totalorder %s649_s17, 2  ;;  %s340_s9 = sand.u32 1, %s629_s12  }
  0x62   : > { %p844_p6 = scmp.ne.s32.totalorder %s837_s24, 0  ;;  %s341_s10 = scalar_lea.sflag [#allocation3], %s340_s9 }
  0x64   : > { %p474_p7 = pnand %p481_p1, %p844_p6 }
  0x66   : > { %624 = dma.done.wait (!%p474_p7), %s341_s10, 64  }
  0x67   : > { %626 = vsyncadd (!%p474_p7), %s341_s10, 4294967232  ;;  %s18_s17 = sadd.s32 1, %s649_s17   ;;  %s845_s12 = smov %s633_s13 }
  0x68   : > { %p15_p9 = scmp.ge.s32.totalorder %s18_s17, 4   ;;  %s846_s13 = smov %s637_s14 }
  0x69   : > { %s847_s14 = smov %s728_s25  ;;  %s848_s15 = smov %s645_s16 }
  0x6a   : > { %s849_s16 = smov %s851_s20  ;;  %17 = sbr.rel (!%p15_p9) target bundleno = 6 (0x6), region = 77 }
  0x71   :  { %346 = vsyncpa [#allocation3], 1 }
  0x72   :  { %348 = vsyncpa [#allocation3 + $0x1], 1 }
  0x73   :  { %349 = vsyncpa [#allocation4], 1 }
  0x74   :  { %351 = vsyncpa [#allocation4 + $0x1], 1 }
  0x75   :  { %352 = vsyncpa [#allocation6], 1 }

</bundles_post_ra>
